<compile_context>
chip_gen: v7x
topology: tpu7x:2x2x1
jax: 0.10.0
libtpu: 0.0.40
codegen_flags: <defaults>
</compile_context>

<pallas_src>
import functools

import numpy as np

import jax
import jax.numpy as jnp
from jax.experimental import pallas as pl
from jax.experimental.pallas import tpu as pltpu


def _decomp_kernel(x_ref, w_ref, res_ref, mean_ref, *, inv_k, b_tile):
    # x_ref:    (b_tile, L, c_tile)  natural-layout tile (lane dim = channels)
    # w_ref:    (L, L)               integer counts matrix (replicate padding
    #                                folded in), stored in x.dtype
    # res_ref:  (b_tile, L, c_tile)  residual = x - moving_mean
    # mean_ref: (b_tile, L, c_tile)  moving_mean
    w = w_ref[...]
    for b in range(b_tile):  # static unroll; each iteration is one MXU matmul
        x_b = x_ref[b]                                              # (L, c_tile)
        acc = jnp.dot(w, x_b, preferred_element_type=jnp.float32)   # counts @ x
        mean = (acc * inv_k).astype(mean_ref.dtype)                 # VPU 1/k scale
        mean_ref[b] = mean
        res_ref[b] = (x_b - mean).astype(res_ref.dtype)


@functools.lru_cache(maxsize=None)
def _counts_matrix_np(seq_len, kernel_size):
    """counts[l, m] = #{off in [-pad, pad] : clip(l + off, 0, L-1) == m}.

    (1/k) * counts @ x reproduces AvgPool1d(kernel_size, stride=1) applied to a
    replicate-padded series exactly (the clip encodes the edge replication).
    Built on the host in O(k*L); entries are small integers (exact in bf16).
    """
    pad = (kernel_size - 1) // 2
    w = np.zeros((seq_len, seq_len), dtype=np.float32)
    rows = np.arange(seq_len)
    for off in range(-pad, pad + 1):
        src = np.clip(rows + off, 0, seq_len - 1)
        w[rows, src] += 1.0
    return w


def series_decomp(x, kernel_size, *, interpret=False):
    """x: (B, L, C) float array. Returns (res, moving_mean), both (B, L, C)."""
    B, L, C = x.shape
    if kernel_size % 2 != 1:
        raise ValueError(
            "series_decomp requires an odd kernel_size so the stride-1 moving "
            "average preserves the sequence length."
        )

    dtype = x.dtype
    itemsize = jnp.dtype(dtype).itemsize
    inv_k = float(1.0 / kernel_size)

    # Exact-integer counts matrix in x.dtype (bf16-safe), 1/k applied in-kernel.
    w = jnp.asarray(_counts_matrix_np(int(L), int(kernel_size)), dtype=dtype)

    # ---- VMEM-aware tiling (per generation) ----------------------------------
    try:
        vmem_cap = int(pltpu.get_tpu_info().vmem_capacity_bytes)
    except Exception:
        vmem_cap = 64 << 20  # conservative fallback (v7x per-TensorCore VMEM)
    vmem_limit = int(min(vmem_cap // 2, 64 << 20))   # 64 MiB on v5e/v6e, 32 MiB on v7x
    budget = vmem_limit * 3 // 4                     # headroom for pipeline internals
    w_bytes = 2 * L * L * itemsize                   # double-buffered resident W
    stream_budget = max(budget - w_bytes, 1 << 20)   # x + res + mean, double-buffered

    per_batch_full_c = 6 * L * C * itemsize          # 3 streams x 2 buffers, full C
    if per_batch_full_c <= stream_budget:
        # Common DLinear case: keep full C per block and fuse batches instead.
        c_tile, c_pad, grid_c = C, C, 1
        b_tile = max(1, min(B, stream_budget // per_batch_full_c, 32))
        while B % b_tile:      # exact blocks only (no partial batch blocks)
            b_tile -= 1
    else:
        # Very wide C: tile channels in lane-dense multiples of 128.
        # TODO(synk): for very long L where the dense (L, L) counts matrix no
        # longer fits VMEM, switch to a banded/halo (roll-based shift-add) path.
        b_tile = 1
        c_tile = max(128, (stream_budget // (6 * L * itemsize)) // 128 * 128)
        c_pad = ((C + c_tile - 1) // c_tile) * c_tile
        grid_c = c_pad // c_tile
    grid_b = B // b_tile

    xin = x
    if c_pad != C:
        xin = jnp.pad(x, ((0, 0), (0, 0), (0, c_pad - C)))

    kernel = functools.partial(_decomp_kernel, inv_k=inv_k, b_tile=b_tile)
    blk_spec = pl.BlockSpec((b_tile, L, c_tile), lambda b, c: (b, 0, c))

    res, mean = pl.pallas_call(
        kernel,
        out_shape=(
            jax.ShapeDtypeStruct((B, L, c_pad), dtype),
            jax.ShapeDtypeStruct((B, L, c_pad), dtype),
        ),
        grid_spec=pltpu.PrefetchScalarGridSpec(
            num_scalar_prefetch=0,
            grid=(grid_b, grid_c),
            in_specs=[
                blk_spec,
                pl.BlockSpec((L, L), lambda b, c: (0, 0)),  # resident, never re-DMA'd
            ],
            out_specs=[blk_spec, blk_spec],
        ),
        compiler_params=pltpu.CompilerParams(
            dimension_semantics=("parallel", "parallel"),
            vmem_limit_bytes=vmem_limit,
        ),
        interpret=interpret,
    )(xin, w)

    if c_pad != C:
        res = res[..., :C]
        mean = mean[..., :C]
    return res, mean


def _reference(x, kernel_size):
    """Pure-JAX reference replicating the PyTorch module exactly."""
    pad = (kernel_size - 1) // 2
    front = jnp.repeat(x[:, 0:1, :], pad, axis=1)
    end = jnp.repeat(x[:, -1:, :], pad, axis=1)
    xp = jnp.concatenate([front, x, end], axis=1)
    L = x.shape[1]
    windows = jnp.stack([xp[:, i:i + L, :] for i in range(kernel_size)], axis=0)
    mean = jnp.mean(windows, axis=0)
    return x - mean, mean


if __name__ == "__main__":
    kernel_size = 5  # odd, stride = 1, as used by DLinear
    B, L, C = 2, 16, 8

    key = jax.random.PRNGKey(0)
    x = jax.random.normal(key, (B, L, C), dtype=jnp.float32)

    res, mean = series_decomp(x, kernel_size)
    res, mean = jax.block_until_ready((res, mean))

    res_ref, mean_ref = _reference(x, kernel_size)
    assert res.shape == x.shape and mean.shape == x.shape
    assert jnp.allclose(mean, mean_ref, atol=1e-5, rtol=1e-5)
    assert jnp.allclose(res, res_ref, atol=1e-5, rtol=1e-5)

    print("KERNEL_OK")
</pallas_src>

<mosaic_0001>
module attributes {stable_mosaic.version = 11 : i64} {
  func.func @_decomp_kernel(%arg0: i32, %arg1: i32, %arg2: memref<2x16x8xf32, #tpu.memory_space<vmem>>, %arg3: memref<16x16xf32, #tpu.memory_space<vmem>>, %arg4: memref<2x16x8xf32, #tpu.memory_space<vmem>>, %arg5: memref<2x16x8xf32, #tpu.memory_space<vmem>>) attributes {dimension_semantics = [#tpu.dimension_semantics<parallel>, #tpu.dimension_semantics<parallel>], iteration_bounds = array<i64: 1, 1>, scalar_prefetch = 0 : i64, scratch_operands = 0 : i64, tpu.core_type = #tpu.core_type<tc>, window_params = [{transform_indices = @transform_0, window_bounds = array<i64: 2, 16, 8>}, {pipeline_mode = #tpu.pipeline_mode<synchronous>, transform_indices = @transform_1, window_bounds = array<i64: 16, 16>}, {transform_indices = @transform_2, window_bounds = array<i64: 2, 16, 8>}, {transform_indices = @transform_3, window_bounds = array<i64: 2, 16, 8>}]} {
    %c0 = arith.constant 0 : index
    %c0_0 = arith.constant 0 : index
    %0 = vector.load %arg3[%c0, %c0_0] : memref<16x16xf32, #tpu.memory_space<vmem>>, vector<16x16xf32>
    %c0_1 = arith.constant 0 : index
    %c0_2 = arith.constant 0 : index
    %c0_3 = arith.constant 0 : index
    %1 = vector.load %arg2[%c0_1, %c0_2, %c0_3] : memref<2x16x8xf32, #tpu.memory_space<vmem>>, vector<1x16x8xf32>
    %2 = vector.shape_cast %1 : vector<1x16x8xf32> to vector<16x8xf32>
    %cst = arith.constant dense<0.000000e+00> : vector<16x8xf32>
    %3 = tpu.matmul %0, %2, %cst {dimension_numbers = #tpu.dot_dimension_numbers<[1], [0], [0], [1], [0, 0, 1, 1], [], []>} : vector<16x16xf32>, vector<16x8xf32>, vector<16x8xf32> -> vector<16x8xf32>
    %cst_4 = arith.constant 2.000000e-01 : f32
    %4 = vector.broadcast %cst_4 : f32 to vector<16x8xf32>
    %5 = arith.mulf %3, %4 : vector<16x8xf32>
    %c0_5 = arith.constant 0 : index
    %c0_6 = arith.constant 0 : index
    %c0_7 = arith.constant 0 : index
    %6 = vector.load %arg5[%c0_5, %c0_6, %c0_7] : memref<2x16x8xf32, #tpu.memory_space<vmem>>, vector<1x16x8xf32>
    %7 = vector.shape_cast %6 : vector<1x16x8xf32> to vector<16x8xf32>
    %8 = vector.shape_cast %5 : vector<16x8xf32> to vector<1x16x8xf32>
    tpu.vector_store %arg5[%c0_5, %c0_6, %c0_7], %8 {strides = array<i32>} : memref<2x16x8xf32, #tpu.memory_space<vmem>>, vector<1x16x8xf32>,
    %9 = arith.subf %2, %5 : vector<16x8xf32>
    %c0_8 = arith.constant 0 : index
    %c0_9 = arith.constant 0 : index
    %c0_10 = arith.constant 0 : index
    %10 = vector.load %arg4[%c0_8, %c0_9, %c0_10] : memref<2x16x8xf32, #tpu.memory_space<vmem>>, vector<1x16x8xf32>
    %11 = vector.shape_cast %10 : vector<1x16x8xf32> to vector<16x8xf32>
    %12 = vector.shape_cast %9 : vector<16x8xf32> to vector<1x16x8xf32>
    tpu.vector_store %arg4[%c0_8, %c0_9, %c0_10], %12 {strides = array<i32>} : memref<2x16x8xf32, #tpu.memory_space<vmem>>, vector<1x16x8xf32>,
    %c1 = arith.constant 1 : index
    %c0_11 = arith.constant 0 : index
    %c0_12 = arith.constant 0 : index
    %13 = vector.load %arg2[%c1, %c0_11, %c0_12] : memref<2x16x8xf32, #tpu.memory_space<vmem>>, vector<1x16x8xf32>
    %14 = vector.shape_cast %13 : vector<1x16x8xf32> to vector<16x8xf32>
    %cst_13 = arith.constant dense<0.000000e+00> : vector<16x8xf32>
    %15 = tpu.matmul %0, %14, %cst_13 {dimension_numbers = #tpu.dot_dimension_numbers<[1], [0], [0], [1], [0, 0, 1, 1], [], []>} : vector<16x16xf32>, vector<16x8xf32>, vector<16x8xf32> -> vector<16x8xf32>
    %cst_14 = arith.constant 2.000000e-01 : f32
    %16 = vector.broadcast %cst_14 : f32 to vector<16x8xf32>
    %17 = arith.mulf %15, %16 : vector<16x8xf32>
    %c1_15 = arith.constant 1 : index
    %c0_16 = arith.constant 0 : index
    %c0_17 = arith.constant 0 : index
    %18 = vector.load %arg5[%c1_15, %c0_16, %c0_17] : memref<2x16x8xf32, #tpu.memory_space<vmem>>, vector<1x16x8xf32>
    %19 = vector.shape_cast %18 : vector<1x16x8xf32> to vector<16x8xf32>
    %20 = vector.shape_cast %17 : vector<16x8xf32> to vector<1x16x8xf32>
    tpu.vector_store %arg5[%c1_15, %c0_16, %c0_17], %20 {strides = array<i32>} : memref<2x16x8xf32, #tpu.memory_space<vmem>>, vector<1x16x8xf32>,
    %21 = arith.subf %14, %17 : vector<16x8xf32>
    %c1_18 = arith.constant 1 : index
    %c0_19 = arith.constant 0 : index
    %c0_20 = arith.constant 0 : index
    %22 = vector.load %arg4[%c1_18, %c0_19, %c0_20] : memref<2x16x8xf32, #tpu.memory_space<vmem>>, vector<1x16x8xf32>
    %23 = vector.shape_cast %22 : vector<1x16x8xf32> to vector<16x8xf32>
    %24 = vector.shape_cast %21 : vector<16x8xf32> to vector<1x16x8xf32>
    tpu.vector_store %arg4[%c1_18, %c0_19, %c0_20], %24 {strides = array<i32>} : memref<2x16x8xf32, #tpu.memory_space<vmem>>, vector<1x16x8xf32>,
    return
  }
  func.func @transform_0(%arg0: i32, %arg1: i32) -> (i32, i32, i32) {
    %c0_i32 = arith.constant 0 : i32
    %c0_i32_0 = arith.constant 0 : i32
    return %arg0, %c0_i32, %arg1 : i32, i32, i32
  }
  func.func @transform_1(%arg0: i32, %arg1: i32) -> (i32, i32) {
    %c0_i32 = arith.constant 0 : i32
    %c0_i32_0 = arith.constant 0 : i32
    %c0_i32_1 = arith.constant 0 : i32
    return %c0_i32, %c0_i32_0 : i32, i32
  }
  func.func @transform_2(%arg0: i32, %arg1: i32) -> (i32, i32, i32) {
    %c0_i32 = arith.constant 0 : i32
    %c0_i32_0 = arith.constant 0 : i32
    return %arg0, %c0_i32, %arg1 : i32, i32, i32
  }
  func.func @transform_3(%arg0: i32, %arg1: i32) -> (i32, i32, i32) {
    %c0_i32 = arith.constant 0 : i32
    %c0_i32_0 = arith.constant 0 : i32
    return %arg0, %c0_i32, %arg1 : i32, i32, i32
  }
}

</mosaic_0001>

<bundles_post_ra>
// kernel: tpu_custom_call.1
= control target key start
LH: loop header
LB: loop body
LE: loop exit
PB: predicated region body
PF: predicated region fallthrough
CT: control target
= control target key end

     0   :  { %vm17_vm0 = vcmask 130048   ;;  %vm101_vm1 = vcmask 64512   ;;  %s318_s0 = inlined_call_operand.vmem [shape: f32[2,16,8], index: 0, kind: input, shape index: {}]   ;;  %s319_s1 = inlined_call_operand.vmem [shape: f32[16,16], index: 1, kind: input, shape index: {}]   ;;  %s320_s3 = inlined_call_operand.vmem [shape: f32[2,16,8], index: 3, kind: output, shape index: {1}]   ;;  %s321_s2 = inlined_call_operand.vmem [shape: f32[2,16,8], index: 2, kind: output, shape index: {0}]  }
   0x1   :  { %v15_v0 = vld [vmem:[%s318_s0] sm:$0xff]  ;;  %v16_v1 = vld [vmem:[%s318_s0 + $0x8] sm:$0xff]  ;;  %v206_v2 = vld [vmem:[%s318_s0 + $0x10] sm:$0xff] }
   0x2   :  { %v236_v3 = vpack.c.bf16 %v16_v1, %v15_v0  ;;  %v207_v4 = vld [vmem:[%s318_s0 + $0x18] sm:$0xff]  ;;  %v13_v5 = vld [vmem:[%s319_s1] sm:$0xff]  ;;  %v14_v7 = vld [vmem:[%s319_s1 + $0x8] sm:$0xff] }
   0x3   :  { %v240_v6 = vpack.c.bf16 %v207_v4, %v206_v2  ;;  %226 = vmatprep.mubr.msk.f32.mxu0 %vm17_vm0, %v13_v5  ;;  %233 = vmatprep.mubr.msk.f32.mxu1 %vm17_vm0, %v13_v5 }
   0x4   :  { %237 = vmatprep.subr.bf16.mxu0 %v236_v3 }
   0x5   :  { %241 = vmatprep.subr.bf16.mxu1 %v240_v6  ;;  %239 = vmatpush3.bf16.msra.mxu0 %v236_v3 }
   0x6   :  { %243 = vmatpush3.bf16.msra.mxu1 %v240_v6 }
   0x8   :  { %227 = vmatmul.mubr.msk.f32.vlgmr.msra.gmra.mrb[0].mxu0 %vm17_vm0, %v14_v7 }
   0x9   :  { %234 = vmatmul.mubr.msk.f32.vlgmr.msra.gmra.mrb[0].mxu1 %vm17_vm0, %v14_v7 }
  0xdb   :  { %v228_v8 = vpop.f32.mrb[0].mxu0 }
  0xdc   :  { %v100_v9 = vmul.f32 0.2, %v228_v8  ;;  %v235_v10 = vpop.f32.mrb[0].mxu1  ;;  %v90_v11 = vpop.f32.mrb[1].mxu0 }
  0xdd   :  { %v187_v12 = vmul.f32 0.2, %v235_v10  ;;  %v99_v13 = vmul.f32 0.2, %v90_v11  ;;  %v177_v14 = vpop.f32.mrb[1].mxu1 }
  0xde   :  { %103 = vst.msk [vmem:[%s320_s3 + $0x8] sm:$0xff] %vm101_vm1, %v100_v9  ;;  %v105_v15 = vsub.f32 %v16_v1, %v100_v9  ;;  %v186_v16 = vmul.f32 0.2, %v177_v14 }
  0xdf   :  { %211 = vst.msk [vmem:[%s320_s3 + $0x18] sm:$0xff] %vm101_vm1, %v187_v12  ;;  %v192_v17 = vsub.f32 %v207_v4, %v187_v12  ;;  %102 = vst.msk [vmem:[%s320_s3] sm:$0xff] %vm101_vm1, %v99_v13  ;;  %v104_v18 = vsub.f32 %v15_v0, %v99_v13 }
  0xe0   :  { %107 = vst.msk [vmem:[%s321_s2 + $0x8] sm:$0xff] %vm101_vm1, %v105_v15  ;;  %210 = vst.msk [vmem:[%s320_s3 + $0x10] sm:$0xff] %vm101_vm1, %v186_v16  ;;  %v191_v19 = vsub.f32 %v206_v2, %v186_v16 }
  0xe1   :  { %213 = vst.msk [vmem:[%s321_s2 + $0x18] sm:$0xff] %vm101_vm1, %v192_v17  ;;  %106 = vst.msk [vmem:[%s321_s2] sm:$0xff] %vm101_vm1, %v104_v18 }
  0xe2   :  { %212 = vst.msk [vmem:[%s321_s2 + $0x10] sm:$0xff] %vm101_vm1, %v191_v19 }

</bundles_post_ra>
